<compile_context>
chip_gen: v7x
topology: tpu7x:2x2x1
jax: 0.10.0
libtpu: 0.0.40
codegen_flags: <defaults>
</compile_context>

<pallas_src>
import functools

import jax
import jax.numpy as jnp
from jax import lax
from jax.experimental import pallas as pl
from jax.experimental.pallas import tpu as pltpu


# ----------------------------- Pallas kernel ---------------------------------

def _bottleneck_kernel(
    x_ref,      # (R, W*C)         f32   Bblk packed images, channels-last rows
    bd1_ref,    # (W*C, W*IC)      bf16  conv1 block-diag, bn1 scale folded
    c1_ref,     # (1, W*IC)        f32   conv1 bias*s1 + t1, tiled over W
    r_ref,      # (K, W*IC, W*IC)  bf16  fused asy taps: band1 @ bd2_i (bn2 scale in)
    cb_ref,     # (K, 1, W*IC)     f32   asy1-bias through tap i: ca1 @ bd2_i
    ca2_ref,    # (1, W*IC)        f32   asy2 bias*s2 + t2, tiled
    bd3_ref,    # (W*IC, W*C)      bf16  conv3 block-diag, bn3 scale folded
    c3_ref,     # (1, W*C)         f32   conv3 bias*s3 + t3, tiled
    o_ref,      # (R, W*C)         f32
    *, K, H,
):
    f32 = jnp.float32
    bf16 = jnp.bfloat16
    P = (K - 1) // 2
    R = x_ref.shape[0]          # rows per block = Bblk * H (static)

    x = x_ref[...]                                            # (R, W*C) f32

    # ---- conv1 (1x1) + bn1 + relu : one lane-dense matmul ----
    h1 = jnp.dot(x.astype(bf16), bd1_ref[...], preferred_element_type=f32)
    h1 = jnp.maximum(h1 + c1_ref[...], 0.0)                   # (R, W*IC) f32
    h1b = h1.astype(bf16)

    # ---- fused AsyConv (1,K) then (K,1), bn2 scale folded ----
    # center tap (dh = 0): no shift, no mask
    acc = jnp.dot(h1b, r_ref[P], preferred_element_type=f32) + cb_ref[P]

    # off-center taps: sublane roll (XLU) + boundary mask (row index within image).
    # Rows rolled across packed-image boundaries are exactly the masked rows.
    row = lax.broadcasted_iota(jnp.int32, (R, 1), 0) % H      # hoisted out of loop
    for i in range(K):
        if i == P:
            continue
        d = i - P
        valid = jnp.logical_and(row + d >= 0, row + d < H)    # (R, 1) bool
        rolled = pltpu.roll(h1, shift=(-d) % R, axis=0)       # out[r] = h1[r + d]
        shifted = jnp.where(valid, rolled, 0.0).astype(bf16)
        acc = acc + jnp.dot(shifted, r_ref[i], preferred_element_type=f32)
        acc = acc + jnp.where(valid, cb_ref[i], 0.0)          # masked asy1-bias term

    a2 = jnp.maximum(acc + ca2_ref[...], 0.0)                 # bn2 shift + relu

    # ---- conv3 (1x1) + bn3 + residual (Dropout2d == identity in eval) ----
    h3 = jnp.dot(a2.astype(bf16), bd3_ref[...], preferred_element_type=f32)
    o_ref[...] = (x + h3 + c3_ref[...]).astype(o_ref.dtype)


# ------------------------------ wrapper ---------------------------------------

def pack_kernel_operands(params, H, W):
    """Fold BN/bias into weights; build block-diag / fused-banded matrices."""
    w1, b1 = params["w1"], params["b1"]            # (C, IC), (IC,)
    wa1, ba1 = params["wa1"], params["ba1"]        # (K, IC, M), (M,)
    wa2, ba2 = params["wa2"], params["ba2"]        # (K, M, IC), (IC,)
    w3, b3 = params["w3"], params["b3"]            # (IC, C), (C,)
    s1, t1 = params["s1"], params["t1"]
    s2, t2 = params["s2"], params["t2"]
    s3, t3 = params["s3"], params["t3"]

    K = wa1.shape[0]
    P = (K - 1) // 2
    bf16 = jnp.bfloat16
    eye_w = jnp.eye(W, dtype=jnp.float32)

    # NOTE: the kron'd weights scale as (W*C)*(W*IC); at large W/C tile along W or
    # switch layout before this blows v7x's 64 MiB VMEM (guarded via vmem estimate).

    # conv1 + bn1 folded, block-diag over the W spatial positions.
    bd1 = jnp.kron(eye_w, w1 * s1[None, :]).astype(bf16)                # (W*C, W*IC)
    c1 = jnp.tile(b1 * s1 + t1, W)[None, :]                             # (1, W*IC)

    # (1,K) asy-conv as one block-banded matrix (f32, fused below).
    band1 = sum(jnp.kron(jnp.eye(W, k=-(j - P), dtype=jnp.float32), wa1[j])
                for j in range(K))                                      # (W*IC, W*M)
    ca1 = jnp.tile(ba1, W)[None, :]                                     # (1, W*M)

    # (K,1) asy-conv per-tap block-diag (bn2 scale folded), fused with band1:
    #   R_i  = band1 @ bd2_i   (acts on un-shifted / row-shifted h1)
    #   cb_i = ca1   @ bd2_i   (asy1-bias contribution, row-masked in kernel)
    bd2 = jnp.stack([jnp.kron(eye_w, wa2[i] * s2[None, :]) for i in range(K)])
    r_taps = jnp.einsum("ab,kbc->kac", band1, bd2).astype(bf16)         # (K,W*IC,W*IC)
    cb = jnp.einsum("ab,kbc->kac", ca1, bd2)                            # (K,1,W*IC) f32
    ca2 = jnp.tile(ba2 * s2 + t2, W)[None, :]                           # (1, W*IC)

    # conv3 + bn3 folded.
    bd3 = jnp.kron(eye_w, w3 * s3[None, :]).astype(bf16)                # (W*IC, W*C)
    c3 = jnp.tile(b3 * s3 + t3, W)[None, :]                             # (1, W*C)

    return {"bd1": bd1, "c1": c1, "r": r_taps, "cb": cb, "ca2": ca2,
            "bd3": bd3, "c3": c3, "K": K}


def _target_rows():
    """Row-block target per TPU generation (MXU M-width)."""
    try:
        kind = jax.devices()[0].device_kind.lower()
    except Exception:
        return 256
    if "v5 lite" in kind or "v5e" in kind:
        return 128          # 4x128x128 MXU saturates at half the rows
    return 256               # v6e / v7x: 2x256x256 MXU


def _pick_bblk(batch, H):
    """Images per grid step: big enough to feed the MXU, but keep grid >= 2 (v7x)."""
    cap = max(1, _target_rows() // H)
    if batch >= 2:
        cap = min(cap, batch // 2)
    bblk = max(1, cap)
    while batch % bblk:
        bblk -= 1
    return bblk


def regular_bottleneck_forward_rows(x_rows, ops, H):
    """Hot-path entry: activations in (B*H, W*C) channels-last row layout."""
    BH, WC = x_rows.shape
    B = BH // H
    K = ops["K"]

    bblk = _pick_bblk(B, H)
    rows = bblk * H
    grid = (B // bblk,)

    operand_names = ("bd1", "c1", "r", "cb", "ca2", "bd3", "c3")
    operands = [ops[n] for n in operand_names]

    def _const(a):
        # Constant-index blocks: the pipeline keeps them resident (no re-DMA).
        # TODO(synk): single-buffer them (pipeline_mode) once weight footprint
        #             matters (large W*C on v7x's 64 MiB VMEM).
        nd = a.ndim
        return pl.BlockSpec(a.shape, lambda b, _nd=nd: (0,) * _nd)

    in_specs = [pl.BlockSpec((rows, WC), lambda b: (b, 0))]
    in_specs += [_const(a) for a in operands]

    kernel = functools.partial(_bottleneck_kernel, K=K, H=H)

    # VMEM estimate: double-buffered weights + double-buffered in/out activation
    # blocks; raise the scoped limit only when the default 32 MiB would not fit.
    weight_bytes = sum(int(a.size) * a.dtype.itemsize for a in operands)
    act_bytes = rows * WC * 4
    est = 2 * weight_bytes + 4 * act_bytes + (1 << 20)
    vmem_limit = int(est) if est > (32 << 20) else None

    return pl.pallas_call(
        kernel,
        out_shape=jax.ShapeDtypeStruct((BH, WC), jnp.float32),
        grid_spec=pltpu.PrefetchScalarGridSpec(
            num_scalar_prefetch=0,
            grid=grid,
            in_specs=in_specs,
            out_specs=pl.BlockSpec((rows, WC), lambda b: (b, 0)),
        ),
        compiler_params=pltpu.CompilerParams(
            dimension_semantics=("parallel",),
            vmem_limit_bytes=vmem_limit),
    )(x_rows, *operands)


def regular_bottleneck_forward_nchw(x_nchw, ops):
    """PyTorch-style entry point: NCHW in, NCHW out.

    TODO(synk): in a real network keep activations in the (B*H, W*C) row layout
    across layers (use regular_bottleneck_forward_rows) — these two transposes are
    extra HBM passes kept only for the NCHW interface / reference check.
    """
    B, C, H, W = x_nchw.shape
    x_rows = jnp.transpose(x_nchw, (0, 2, 3, 1)).reshape(B * H, W * C)
    out_rows = regular_bottleneck_forward_rows(x_rows, ops, H)
    return jnp.transpose(out_rows.reshape(B, H, W, C), (0, 3, 1, 2))


# --------------------------- parameter setup -----------------------------------

def make_params(key, channels, internal_channels, K=3):
    """Deterministic synthetic parameters (PyTorch layouts -> kernel layouts)."""
    M = 8  # middle_channels is hard-coded to 8 in the module
    eps = 1e-5
    ks = jax.random.split(key, 20)

    def n(k, shape, scale=0.1):
        return scale * jax.random.normal(k, shape, dtype=jnp.float32)

    # PyTorch-layout raw weights (out, in, kh, kw)
    w_conv1 = n(ks[0], (internal_channels, channels, 1, 1))
    b_conv1 = n(ks[1], (internal_channels,))
    w_asy1 = n(ks[2], (M, internal_channels, 1, K))
    b_asy1 = n(ks[3], (M,))
    w_asy2 = n(ks[4], (internal_channels, M, K, 1))
    b_asy2 = n(ks[5], (internal_channels,))
    w_conv3 = n(ks[6], (channels, internal_channels, 1, 1))
    b_conv3 = n(ks[7], (channels,))

    def bn(kg, kb, km, kv, c):
        gamma = 1.0 + n(kg, (c,))
        beta = n(kb, (c,))
        rmean = n(km, (c,))
        rvar = 1.0 + 0.1 * jnp.abs(jax.random.normal(kv, (c,), dtype=jnp.float32))
        scale = gamma / jnp.sqrt(rvar + eps)
        shift = beta - rmean * scale
        return scale, shift

    s1, t1 = bn(ks[8], ks[9], ks[10], ks[11], internal_channels)
    s2, t2 = bn(ks[12], ks[13], ks[14], ks[15], internal_channels)
    s3, t3 = bn(ks[16], ks[17], ks[18], ks[19], channels)

    return {
        # kernel-layout weights
        "w1": jnp.transpose(w_conv1[:, :, 0, 0], (1, 0)),      # (C, IC)
        "b1": b_conv1,
        "wa1": jnp.transpose(w_asy1[:, :, 0, :], (2, 1, 0)),   # (K, IC, M)
        "ba1": b_asy1,
        "wa2": jnp.transpose(w_asy2[:, :, :, 0], (2, 1, 0)),   # (K, M, IC)
        "ba2": b_asy2,
        "w3": jnp.transpose(w_conv3[:, :, 0, 0], (1, 0)),      # (IC, C)
        "b3": b_conv3,
        "s1": s1, "t1": t1, "s2": s2, "t2": t2, "s3": s3, "t3": t3,
        # raw (PyTorch-layout) copies for the pure-JAX reference
        "_raw": (w_conv1, b_conv1, w_asy1, b_asy1, w_asy2, b_asy2, w_conv3, b_conv3),
    }


# ----------------------------- pure-JAX reference ------------------------------

def reference_forward_nchw(x_nchw, params, K=3):
    """Reference using lax.conv_general_dilated (NCHW / OIHW), eval-mode BN."""
    (w1, b1, wa1, ba1, wa2, ba2, w3, b3) = params["_raw"]
    P = (K - 1) // 2
    dn = ("NCHW", "OIHW", "NCHW")

    def conv(x, w, b, padding):
        y = lax.conv_general_dilated(x, w, window_strides=(1, 1),
                                     padding=padding, dimension_numbers=dn)
        return y + b.reshape(1, -1, 1, 1)

    def bn_apply(x, s, t):
        return x * s.reshape(1, -1, 1, 1) + t.reshape(1, -1, 1, 1)

    ext = conv(x_nchw, w1, b1, "VALID")
    ext = jnp.maximum(bn_apply(ext, params["s1"], params["t1"]), 0.0)
    ext = conv(ext, wa1, ba1, ((0, 0), (P, P)))
    ext = conv(ext, wa2, ba2, ((P, P), (0, 0)))
    ext = jnp.maximum(bn_apply(ext, params["s2"], params["t2"]), 0.0)
    ext = conv(ext, w3, b3, "VALID")
    ext = bn_apply(ext, params["s3"], params["t3"])
    return x_nchw + ext


# ----------------------------------- main ---------------------------------------

if __name__ == "__main__":
    B, C, H, W = 4, 16, 16, 16     # B=4 -> Bblk=2: exercises packed-image row blocks
    IC = 8                          # internal_channels
    K = 3                           # arc_num = 2 -> asy_kernel_size = 3

    key = jax.random.PRNGKey(0)
    kx, kp = jax.random.split(key)
    x = jax.random.normal(kx, (B, C, H, W), dtype=jnp.float32)
    params = make_params(kp, C, IC, K=K)
    ops = pack_kernel_operands(params, H, W)

    out = jax.block_until_ready(regular_bottleneck_forward_nchw(x, ops))
    ref = jax.block_until_ready(reference_forward_nchw(x, params, K=K))

    assert out.shape == (B, C, H, W)
    max_err = float(jnp.max(jnp.abs(out - ref)))
    # bf16 matmul inputs (f32 accumulation) -> loosen tolerance vs f32 reference.
    assert jnp.allclose(out, ref, atol=3e-2, rtol=3e-2), max_err

    print("KERNEL_OK")
</pallas_src>

<mosaic_0001>
module attributes {stable_mosaic.version = 11 : i64} {
  func.func @_bottleneck_kernel(%arg0: i32, %arg1: memref<32x256xf32, #tpu.memory_space<vmem>>, %arg2: memref<256x128xbf16, #tpu.memory_space<vmem>>, %arg3: memref<1x128xf32, #tpu.memory_space<vmem>>, %arg4: memref<3x128x128xbf16, #tpu.memory_space<vmem>>, %arg5: memref<3x1x128xf32, #tpu.memory_space<vmem>>, %arg6: memref<1x128xf32, #tpu.memory_space<vmem>>, %arg7: memref<128x256xbf16, #tpu.memory_space<vmem>>, %arg8: memref<1x256xf32, #tpu.memory_space<vmem>>, %arg9: memref<32x256xf32, #tpu.memory_space<vmem>>) attributes {dimension_semantics = [#tpu.dimension_semantics<parallel>], iteration_bounds = array<i64: 2>, scalar_prefetch = 0 : i64, scratch_operands = 0 : i64, tpu.core_type = #tpu.core_type<tc>, window_params = [{transform_indices = @transform_0, window_bounds = array<i64: 32, 256>}, {pipeline_mode = #tpu.pipeline_mode<synchronous>, transform_indices = @transform_1, window_bounds = array<i64: 256, 128>}, {pipeline_mode = #tpu.pipeline_mode<synchronous>, transform_indices = @transform_2, window_bounds = array<i64: 1, 128>}, {pipeline_mode = #tpu.pipeline_mode<synchronous>, transform_indices = @transform_3, window_bounds = array<i64: 3, 128, 128>}, {pipeline_mode = #tpu.pipeline_mode<synchronous>, transform_indices = @transform_4, window_bounds = array<i64: 3, 1, 128>}, {pipeline_mode = #tpu.pipeline_mode<synchronous>, transform_indices = @transform_5, window_bounds = array<i64: 1, 128>}, {pipeline_mode = #tpu.pipeline_mode<synchronous>, transform_indices = @transform_6, window_bounds = array<i64: 128, 256>}, {pipeline_mode = #tpu.pipeline_mode<synchronous>, transform_indices = @transform_7, window_bounds = array<i64: 1, 256>}, {transform_indices = @transform_8, window_bounds = array<i64: 32, 256>}]} {
    %c0 = arith.constant 0 : index
    %c0_0 = arith.constant 0 : index
    %0 = vector.load %arg1[%c0, %c0_0] : memref<32x256xf32, #tpu.memory_space<vmem>>, vector<32x256xf32>
    %1 = arith.truncf %0 : vector<32x256xf32> to vector<32x256xbf16>
    %c0_1 = arith.constant 0 : index
    %c0_2 = arith.constant 0 : index
    %2 = vector.load %arg2[%c0_1, %c0_2] : memref<256x128xbf16, #tpu.memory_space<vmem>>, vector<256x128xbf16>
    %cst = arith.constant dense<0.000000e+00> : vector<32x128xf32>
    %3 = tpu.matmul %1, %2, %cst {dimension_numbers = #tpu.dot_dimension_numbers<[1], [0], [0], [1], [0, 0, 1, 1], [], []>} : vector<32x256xbf16>, vector<256x128xbf16>, vector<32x128xf32> -> vector<32x128xf32>
    %c0_3 = arith.constant 0 : index
    %c0_4 = arith.constant 0 : index
    %4 = vector.load %arg3[%c0_3, %c0_4] : memref<1x128xf32, #tpu.memory_space<vmem>>, vector<1x128xf32>
    %5 = vector.broadcast %4 : vector<1x128xf32> to vector<32x128xf32>
    %6 = arith.addf %3, %5 : vector<32x128xf32>
    %cst_5 = arith.constant 0.000000e+00 : f32
    %7 = vector.broadcast %cst_5 : f32 to vector<32x128xf32>
    %8 = arith.maximumf %6, %7 : vector<32x128xf32>
    %9 = arith.truncf %8 : vector<32x128xf32> to vector<32x128xbf16>
    %c1 = arith.constant 1 : index
    %c0_6 = arith.constant 0 : index
    %c0_7 = arith.constant 0 : index
    %10 = vector.load %arg4[%c1, %c0_6, %c0_7] : memref<3x128x128xbf16, #tpu.memory_space<vmem>>, vector<1x128x128xbf16>
    %11 = vector.shape_cast %10 : vector<1x128x128xbf16> to vector<128x128xbf16>
    %cst_8 = arith.constant dense<0.000000e+00> : vector<32x128xf32>
    %12 = tpu.matmul %9, %11, %cst_8 {dimension_numbers = #tpu.dot_dimension_numbers<[1], [0], [0], [1], [0, 0, 1, 1], [], []>} : vector<32x128xbf16>, vector<128x128xbf16>, vector<32x128xf32> -> vector<32x128xf32>
    %c1_9 = arith.constant 1 : index
    %c0_10 = arith.constant 0 : index
    %c0_11 = arith.constant 0 : index
    %13 = vector.load %arg5[%c1_9, %c0_10, %c0_11] : memref<3x1x128xf32, #tpu.memory_space<vmem>>, vector<1x1x128xf32>
    %14 = vector.shape_cast %13 : vector<1x1x128xf32> to vector<1x128xf32>
    %15 = vector.broadcast %14 : vector<1x128xf32> to vector<32x128xf32>
    %16 = arith.addf %12, %15 : vector<32x128xf32>
    %17 = tpu.iota {dimensions = array<i32: 0>} : vector<32x1xi32>
    %c16_i32 = arith.constant 16 : i32
    %c0_i32 = arith.constant 0 : i32
    %18 = arith.cmpi eq, %c16_i32, %c0_i32 : i32
    %c1_i32 = arith.constant 1 : i32
    %19 = arith.select %18, %c1_i32, %c16_i32 : i32
    %20 = vector.broadcast %19 : i32 to vector<32x1xi32>
    %21 = arith.remsi %17, %20 : vector<32x1xi32>
    %c0_i32_12 = arith.constant 0 : i32
    %22 = vector.broadcast %c0_i32_12 : i32 to vector<32x1xi32>
    %23 = arith.cmpi ne, %21, %22 : vector<32x1xi32>
    %c0_i32_13 = arith.constant 0 : i32
    %24 = vector.broadcast %c0_i32_13 : i32 to vector<32x1xi32>
    %25 = arith.cmpi slt, %21, %24 : vector<32x1xi32>
    %c0_i32_14 = arith.constant 0 : i32
    %26 = arith.cmpi slt, %19, %c0_i32_14 : i32
    %27 = vector.broadcast %26 : i1 to vector<32x1xi1>
    %28 = vector.broadcast %27 : vector<32x1xi1> to vector<32x1xi1>
    %29 = arith.xori %25, %28 : vector<32x1xi1>
    %30 = arith.andi %29, %23 : vector<32x1xi1>
    %31 = vector.broadcast %19 : i32 to vector<32x1xi32>
    %32 = arith.addi %21, %31 : vector<32x1xi32>
    %33 = arith.select %30, %32, %21 : vector<32x1xi1>, vector<32x1xi32>
    %c-1_i32 = arith.constant -1 : i32
    %34 = vector.broadcast %c-1_i32 : i32 to vector<32x1xi32>
    %35 = arith.addi %33, %34 : vector<32x1xi32>
    %c0_i32_15 = arith.constant 0 : i32
    %36 = vector.broadcast %c0_i32_15 : i32 to vector<32x1xi32>
    %37 = arith.cmpi sge, %35, %36 : vector<32x1xi32>
    %c-1_i32_16 = arith.constant -1 : i32
    %38 = vector.broadcast %c-1_i32_16 : i32 to vector<32x1xi32>
    %39 = arith.addi %33, %38 : vector<32x1xi32>
    %c16_i32_17 = arith.constant 16 : i32
    %40 = vector.broadcast %c16_i32_17 : i32 to vector<32x1xi32>
    %41 = arith.cmpi slt, %39, %40 : vector<32x1xi32>
    %42 = arith.andi %37, %41 : vector<32x1xi1>
    %c1_i32_18 = arith.constant 1 : i32
    %43 = tpu.dynamic_rotate %8 by %c1_i32_18 dim 0 : vector<32x128xf32>, i32 -> vector<32x128xf32>
    %cst_19 = arith.constant 0.000000e+00 : f32
    %44 = vector.shape_cast %42 : vector<32x1xi1> to vector<32x1xi1>
    %45 = vector.broadcast %44 : vector<32x1xi1> to vector<32x128xi1>
    %46 = vector.broadcast %cst_19 : f32 to vector<32x128xf32>
    %47 = arith.select %45, %43, %46 : vector<32x128xi1>, vector<32x128xf32>
    %48 = arith.truncf %47 : vector<32x128xf32> to vector<32x128xbf16>
    %c0_20 = arith.constant 0 : index
    %c0_21 = arith.constant 0 : index
    %c0_22 = arith.constant 0 : index
    %49 = vector.load %arg4[%c0_20, %c0_21, %c0_22] : memref<3x128x128xbf16, #tpu.memory_space<vmem>>, vector<1x128x128xbf16>
    %50 = vector.shape_cast %49 : vector<1x128x128xbf16> to vector<128x128xbf16>
    %cst_23 = arith.constant dense<0.000000e+00> : vector<32x128xf32>
    %51 = tpu.matmul %48, %50, %cst_23 {dimension_numbers = #tpu.dot_dimension_numbers<[1], [0], [0], [1], [0, 0, 1, 1], [], []>} : vector<32x128xbf16>, vector<128x128xbf16>, vector<32x128xf32> -> vector<32x128xf32>
    %52 = arith.addf %16, %51 : vector<32x128xf32>
    %c0_24 = arith.constant 0 : index
    %c0_25 = arith.constant 0 : index
    %c0_26 = arith.constant 0 : index
    %53 = vector.load %arg5[%c0_24, %c0_25, %c0_26] : memref<3x1x128xf32, #tpu.memory_space<vmem>>, vector<1x1x128xf32>
    %54 = vector.shape_cast %53 : vector<1x1x128xf32> to vector<1x128xf32>
    %cst_27 = arith.constant 0.000000e+00 : f32
    %55 = vector.shape_cast %42 : vector<32x1xi1> to vector<32x1xi1>
    %56 = vector.broadcast %55 : vector<32x1xi1> to vector<32x128xi1>
    %57 = vector.shape_cast %54 : vector<1x128xf32> to vector<1x128xf32>
    %58 = vector.broadcast %57 : vector<1x128xf32> to vector<32x128xf32>
    %59 = vector.broadcast %cst_27 : f32 to vector<32x128xf32>
    %60 = arith.select %56, %58, %59 : vector<32x128xi1>, vector<32x128xf32>
    %61 = arith.addf %52, %60 : vector<32x128xf32>
    %c1_i32_28 = arith.constant 1 : i32
    %62 = vector.broadcast %c1_i32_28 : i32 to vector<32x1xi32>
    %63 = arith.addi %33, %62 : vector<32x1xi32>
    %c0_i32_29 = arith.constant 0 : i32
    %64 = vector.broadcast %c0_i32_29 : i32 to vector<32x1xi32>
    %65 = arith.cmpi sge, %63, %64 : vector<32x1xi32>
    %c1_i32_30 = arith.constant 1 : i32
    %66 = vector.broadcast %c1_i32_30 : i32 to vector<32x1xi32>
    %67 = arith.addi %33, %66 : vector<32x1xi32>
    %c16_i32_31 = arith.constant 16 : i32
    %68 = vector.broadcast %c16_i32_31 : i32 to vector<32x1xi32>
    %69 = arith.cmpi slt, %67, %68 : vector<32x1xi32>
    %70 = arith.andi %65, %69 : vector<32x1xi1>
    %c31_i32 = arith.constant 31 : i32
    %71 = tpu.dynamic_rotate %8 by %c31_i32 dim 0 : vector<32x128xf32>, i32 -> vector<32x128xf32>
    %cst_32 = arith.constant 0.000000e+00 : f32
    %72 = vector.shape_cast %70 : vector<32x1xi1> to vector<32x1xi1>
    %73 = vector.broadcast %72 : vector<32x1xi1> to vector<32x128xi1>
    %74 = vector.broadcast %cst_32 : f32 to vector<32x128xf32>
    %75 = arith.select %73, %71, %74 : vector<32x128xi1>, vector<32x128xf32>
    %76 = arith.truncf %75 : vector<32x128xf32> to vector<32x128xbf16>
    %c2 = arith.constant 2 : index
    %c0_33 = arith.constant 0 : index
    %c0_34 = arith.constant 0 : index
    %77 = vector.load %arg4[%c2, %c0_33, %c0_34] : memref<3x128x128xbf16, #tpu.memory_space<vmem>>, vector<1x128x128xbf16>
    %78 = vector.shape_cast %77 : vector<1x128x128xbf16> to vector<128x128xbf16>
    %cst_35 = arith.constant dense<0.000000e+00> : vector<32x128xf32>
    %79 = tpu.matmul %76, %78, %cst_35 {dimension_numbers = #tpu.dot_dimension_numbers<[1], [0], [0], [1], [0, 0, 1, 1], [], []>} : vector<32x128xbf16>, vector<128x128xbf16>, vector<32x128xf32> -> vector<32x128xf32>
    %80 = arith.addf %61, %79 : vector<32x128xf32>
    %c2_36 = arith.constant 2 : index
    %c0_37 = arith.constant 0 : index
    %c0_38 = arith.constant 0 : index
    %81 = vector.load %arg5[%c2_36, %c0_37, %c0_38] : memref<3x1x128xf32, #tpu.memory_space<vmem>>, vector<1x1x128xf32>
    %82 = vector.shape_cast %81 : vector<1x1x128xf32> to vector<1x128xf32>
    %cst_39 = arith.constant 0.000000e+00 : f32
    %83 = vector.shape_cast %70 : vector<32x1xi1> to vector<32x1xi1>
    %84 = vector.broadcast %83 : vector<32x1xi1> to vector<32x128xi1>
    %85 = vector.shape_cast %82 : vector<1x128xf32> to vector<1x128xf32>
    %86 = vector.broadcast %85 : vector<1x128xf32> to vector<32x128xf32>
    %87 = vector.broadcast %cst_39 : f32 to vector<32x128xf32>
    %88 = arith.select %84, %86, %87 : vector<32x128xi1>, vector<32x128xf32>
    %89 = arith.addf %80, %88 : vector<32x128xf32>
    %c0_40 = arith.constant 0 : index
    %c0_41 = arith.constant 0 : index
    %90 = vector.load %arg6[%c0_40, %c0_41] : memref<1x128xf32, #tpu.memory_space<vmem>>, vector<1x128xf32>
    %91 = vector.broadcast %90 : vector<1x128xf32> to vector<32x128xf32>
    %92 = arith.addf %89, %91 : vector<32x128xf32>
    %cst_42 = arith.constant 0.000000e+00 : f32
    %93 = vector.broadcast %cst_42 : f32 to vector<32x128xf32>
    %94 = arith.maximumf %92, %93 : vector<32x128xf32>
    %95 = arith.truncf %94 : vector<32x128xf32> to vector<32x128xbf16>
    %c0_43 = arith.constant 0 : index
    %c0_44 = arith.constant 0 : index
    %96 = vector.load %arg7[%c0_43, %c0_44] : memref<128x256xbf16, #tpu.memory_space<vmem>>, vector<128x256xbf16>
    %cst_45 = arith.constant dense<0.000000e+00> : vector<32x256xf32>
    %97 = tpu.matmul %95, %96, %cst_45 {dimension_numbers = #tpu.dot_dimension_numbers<[1], [0], [0], [1], [0, 0, 1, 1], [], []>} : vector<32x128xbf16>, vector<128x256xbf16>, vector<32x256xf32> -> vector<32x256xf32>
    %98 = arith.addf %0, %97 : vector<32x256xf32>
    %c0_46 = arith.constant 0 : index
    %c0_47 = arith.constant 0 : index
    %99 = vector.load %arg8[%c0_46, %c0_47] : memref<1x256xf32, #tpu.memory_space<vmem>>, vector<1x256xf32>
    %100 = vector.broadcast %99 : vector<1x256xf32> to vector<32x256xf32>
    %101 = arith.addf %98, %100 : vector<32x256xf32>
    %c0_48 = arith.constant 0 : index
    %c0_49 = arith.constant 0 : index
    %102 = vector.load %arg9[%c0_48, %c0_49] : memref<32x256xf32, #tpu.memory_space<vmem>>, vector<32x256xf32>
    tpu.vector_store %arg9[%c0_48, %c0_49], %101 {strides = array<i32>} : memref<32x256xf32, #tpu.memory_space<vmem>>, vector<32x256xf32>,
    return
  }
  func.func @transform_0(%arg0: i32) -> (i32, i32) {
    %c0_i32 = arith.constant 0 : i32
    %c0_i32_0 = arith.constant 0 : i32
    return %arg0, %c0_i32 : i32, i32
  }
  func.func @transform_1(%arg0: i32) -> (i32, i32) {
    %c0_i32 = arith.constant 0 : i32
    %c0_i32_0 = arith.constant 0 : i32
    %c0_i32_1 = arith.constant 0 : i32
    return %c0_i32, %c0_i32_0 : i32, i32
  }
  func.func @transform_2(%arg0: i32) -> (i32, i32) {
    %c0_i32 = arith.constant 0 : i32
    %c0_i32_0 = arith.constant 0 : i32
    %c0_i32_1 = arith.constant 0 : i32
    return %c0_i32, %c0_i32_0 : i32, i32
  }
  func.func @transform_3(%arg0: i32) -> (i32, i32, i32) {
    %c0_i32 = arith.constant 0 : i32
    %c0_i32_0 = arith.constant 0 : i32
    %c0_i32_1 = arith.constant 0 : i32
    %c0_i32_2 = arith.constant 0 : i32
    return %c0_i32, %c0_i32_0, %c0_i32_1 : i32, i32, i32
  }
  func.func @transform_4(%arg0: i32) -> (i32, i32, i32) {
    %c0_i32 = arith.constant 0 : i32
    %c0_i32_0 = arith.constant 0 : i32
    %c0_i32_1 = arith.constant 0 : i32
    %c0_i32_2 = arith.constant 0 : i32
    return %c0_i32, %c0_i32_0, %c0_i32_1 : i32, i32, i32
  }
  func.func @transform_5(%arg0: i32) -> (i32, i32) {
    %c0_i32 = arith.constant 0 : i32
    %c0_i32_0 = arith.constant 0 : i32
    %c0_i32_1 = arith.constant 0 : i32
    return %c0_i32, %c0_i32_0 : i32, i32
  }
  func.func @transform_6(%arg0: i32) -> (i32, i32) {
    %c0_i32 = arith.constant 0 : i32
    %c0_i32_0 = arith.constant 0 : i32
    %c0_i32_1 = arith.constant 0 : i32
    return %c0_i32, %c0_i32_0 : i32, i32
  }
  func.func @transform_7(%arg0: i32) -> (i32, i32) {
    %c0_i32 = arith.constant 0 : i32
    %c0_i32_0 = arith.constant 0 : i32
    %c0_i32_1 = arith.constant 0 : i32
    return %c0_i32, %c0_i32_0 : i32, i32
  }
  func.func @transform_8(%arg0: i32) -> (i32, i32) {
    %c0_i32 = arith.constant 0 : i32
    %c0_i32_0 = arith.constant 0 : i32
    return %arg0, %c0_i32 : i32, i32
  }
}

</mosaic_0001>

<bundles_post_ra>
// kernel: tpu_custom_call.1
= control target key start
LH: loop header
LB: loop body
LE: loop exit
PB: predicated region body
PF: predicated region fallthrough
CT: control target
= control target key end

     0   :  { %13 = vsyncpa [#allocation3], 0  ;;  %s2435_s0 = inlined_call_operand.hbm [shape: f32[64,256], index: 0, kind: input, shape index: {}]   ;;  %s2436_s1 = inlined_call_operand.hbm [shape: bf16[256,128], index: 1, kind: input, shape index: {}]   ;;  %s2437_s2 = inlined_call_operand.vmem [shape: f32[1,128], index: 2, kind: input, shape index: {}]   ;;  %s2438_s3 = inlined_call_operand.hbm [shape: bf16[3,128,128], index: 3, kind: input, shape index: {}]   ;;  %s2439_s4 = inlined_call_operand.vmem [shape: f32[3,1,128], index: 4, kind: input, shape index: {}]   ;;  %s2440_s5 = inlined_call_operand.vmem [shape: f32[1,128], index: 5, kind: input, shape index: {}]   ;;  %s2441_s6 = inlined_call_operand.hbm [shape: bf16[128,256], index: 6, kind: input, shape index: {}]   ;;  %s2442_s7 = inlined_call_operand.vmem [shape: f32[1,256], index: 7, kind: input, shape index: {}]   ;;  %s2443_s8 = inlined_call_operand.hbm [shape: f32[64,256], index: 8, kind: output, shape index: {}]  }
   0x1   :  { %15 = vsyncpa [#allocation3 + $0x1], 0 }
   0x2   :  { %16 = vsyncpa [#allocation6], 0 }
   0x3   :  { %17 = vsyncpa [#allocation9], 0 }
   0x4   :  { %18 = vsyncpa [#allocation4], 0 }
   0x5   :  { %20 = vsyncpa [#allocation4 + $0x1], 0  ;;  %s2048_s27 = smov 0   ;;  %s2050_s28 = smov 0  }
   0x6   :  { %s2052_s29 = smov 0   ;;  %s2054_s30 = smov 0  }
   0x7 LB: > { %2449 = sst [smem:[#allocation15_spill]] %s1974_s27  ;;  %s2069_s9 = sadd.s32 4294967295, %s1986_s30   ;;  %s1986_s30 = sphi %s2054_s30, %s2473_s30   ;;  %s1982_s29 = sphi %s2052_s29, %s2472_s29   ;;  %s1978_s28 = sphi %s2050_s28, %s2471_s28   ;;  %s1974_s27 = sphi %s2048_s27, %s2470_s27  }
   0x8   : > { %s1412_s10 = sadd.s32 4294967294, %s1986_s30   ;;  %p46_p0 = scmp.ne.s32.totalorder %s1978_s28, %s1974_s27 }
   0x9   : > { %p2444_p1 = scmp.eq.s32.totalorder %s2069_s9, 0  ;;  %p223_p3 = scmp.eq.s32.totalorder %s1412_s10, 1 }
   0xa   : > { %p1413_p5 = scmp.ge.s32.totalorder %s1986_s30, 1  ;;  %p230_p7 = scmp.lt.s32.totalorder %s1986_s30, 3 }
   0xb   : > { %p2078_p4 = por %p2444_p1, %p46_p0  ;;  %p2083_p6 = por %p223_p3, %p46_p0 }
   0xc   : > { %p2088_p8 = pnand %p1413_p5, %p230_p7  ;;  %s1988_s14 = smov [#allocation5]  }
   0xd   : > { %s2450_s11 = scalar_select %p2078_p4, 1, 0 }
   0xe   : > { %s2451_s12 = scalar_select %p2083_p6, 1, 0 }
   0xf   : > { %s2453_s13 = scalar_select %p2088_p8, 1, 0 }
  0x10   : > { %2452 = sst [smem:[#allocation16_spill]] %s2451_s12  ;;  %s242_s15 = sshll.u32 %s1988_s14, 4  ;;  %s2092_s15 = int_to_ptr.vmem [resolvable:$true] %s242_s15 }
  0x11   : > { %p1663_p9 = pneg %p2088_p8  ;;  %s1989_s17 = smov [#allocation7]  }
  0x12   : > { %s258_s18 = sshll.u32 %s1989_s17, 4  ;;  %s1990_s19 = smov [#allocation8]   ;;  %s2103_s18 = int_to_ptr.vmem [resolvable:$true] %s258_s18 }
  0x13   : > { %p2099_p11 = pnand %p1663_p9, %p2444_p1  ;;  %s2105_s20 = sshll.u32 %s1990_s19, 4  ;;  %s278_s20 = int_to_ptr.vmem [resolvable:$true] %s2105_s20 }
  0x14   : > { %s1798_s23 = scalar_lea.hbm %s2436_s1, 2048 }
  0x15   : > { %p1799_p12 = scmp.ne.s32.totalorder %s2436_s1, %s1798_s23  ;;  %p2115_p13 = pneg %p2099_p11 }
  0x16   : > { %p1805_p5 = scmp.lt.u32.totalorder %s1798_s23, %s2436_s1 }
  0x17   : > { %p1801_p0 = pnand %p2115_p13, %p1799_p12 }
  0x19   : > { %p1802_p3 = pneg %p1801_p0 }
  0x1b   : > { %p1807_p7 = pnand %p1805_p5, %p1802_p3 }
  0x1d   : > { %1810 = shalt.err (!%p1807_p7)
}
  0x1e   : > { %s1811_s17 = scalar_lea.vmem %s2092_s15, 2048  ;;  %p1819_p2 = scmp.lt.s32.totalorder %s2092_s15, %s2092_s15 }
  0x1f   : > { %p1812_p9 = scmp.ne.s32.totalorder %s2092_s15, %s1811_s17  ;;  %p1820_p6 = scmp.lt.s32.totalorder %s1811_s17, %s1811_s17 }
  0x21   : > { %p1814_p10 = pnand %p1812_p9, %p2115_p13  ;;  %p1821_p12 = por %p1820_p6, %p1819_p2 }
  0x23   : > { %p1815_p1 = pneg %p1814_p10 }
  0x25   : > { %p1822_p0 = pnand %p1821_p12, %p1815_p1 }
  0x27   : > { %1825 = shalt.err (!%p1822_p0)
}
  0x28   : > { %s1991_s19 = smov 64   ;;  %s1992_s21 = smov 4  }
  0x29   : > { %1666 = dma.hbm_to_vmem [thread:$0]  (!%p2099_p11), %s2436_s1, 2048, %s2092_s15, [#allocation6], %s1991_s19, %s1991_s19, %s1992_s21  }
  0x2a   : > { %s1826_s10 = scalar_lea.hbm %s2438_s3, 3072 }
  0x2b   : > { %p1827_p2 = scmp.ne.s32.totalorder %s2438_s3, %s1826_s10  ;;  %p1833_p10 = scmp.lt.u32.totalorder %s1826_s10, %s2438_s3 }
  0x2d   : > { %p1829_p1 = pnand %p1827_p2, %p2115_p13 }
  0x2f   : > { %p1830_p6 = pneg %p1829_p1 }
  0x31   : > { %p1835_p3 = pnand %p1833_p10, %p1830_p6 }
  0x33   : > { %1838 = shalt.err (!%p1835_p3)
}
  0x34   : > { %s1839_s15 = scalar_lea.vmem %s2103_s18, 3072  ;;  %p1847_p12 = scmp.lt.s32.totalorder %s2103_s18, %s2103_s18 }
  0x35   : > { %p1840_p5 = scmp.ne.s32.totalorder %s2103_s18, %s1839_s15  ;;  %p1848_p0 = scmp.lt.s32.totalorder %s1839_s15, %s1839_s15 }
  0x37   : > { %p1842_p7 = pnand %p1840_p5, %p2115_p13  ;;  %p1849_p2 = por %p1848_p0, %p1847_p12 }
  0x39   : > { %p1843_p9 = pneg %p1842_p7 }
  0x3b   : > { %p1850_p1 = pnand %p1849_p2, %p1843_p9 }
  0x3d   : > { %1853 = shalt.err (!%p1850_p1)
}
  0x3e   : > { %1669 = dma.hbm_to_vmem [thread:$0]  (!%p2099_p11), %s2438_s3, 3072, %s2103_s18, [#allocation6], %s1991_s19, %s1991_s19, %s1992_s21  }
  0x3f   : > { %s1854_s24 = scalar_lea.hbm %s2441_s6, 2048 }
  0x40   : > { %p1855_p6 = scmp.ne.s32.totalorder %s2441_s6, %s1854_s24  ;;  %p1861_p5 = scmp.lt.u32.totalorder %s1854_s24, %s2441_s6 }
  0x42   : > { %p1857_p10 = pnand %p1855_p6, %p2115_p13 }
  0x44   : > { %p1858_p3 = pneg %p1857_p10 }
  0x46   : > { %p1863_p7 = pnand %p1861_p5, %p1858_p3 }
  0x48   : > { %1866 = shalt.err (!%p1863_p7)
}
  0x49   : > { %s1867_s15 = scalar_lea.vmem %s278_s20, 2048  ;;  %p1875_p2 = scmp.lt.s32.totalorder %s278_s20, %s278_s20 }
  0x4a   : > { %p1868_p9 = scmp.ne.s32.totalorder %s278_s20, %s1867_s15  ;;  %p1876_p1 = scmp.lt.s32.totalorder %s1867_s15, %s1867_s15 }
  0x4c   : > { %p1870_p12 = pnand %p1868_p9, %p2115_p13  ;;  %p1877_p4 = por %p1876_p1, %p1875_p2 }
  0x4e   : > { %p1871_p0 = pneg %p1870_p12 }
  0x50   : > { %p1878_p8 = pnand %p1877_p4, %p1871_p0 }
  0x52   : > { %1881 = shalt.err (!%p1878_p8)
}
  0x53   : > { %s1993_s18 = smov 128   ;;  %s1994_s26 = smov 8  }
  0x54   : > { %1672 = dma.hbm_to_vmem [thread:$0]  (!%p2099_p11), %s2441_s6, 2048, %s278_s20, [#allocation9], %s1993_s18, %s1993_s18, %s1994_s26  }
  0x55   : > { %s2179_s27 = sadd.s32 1, %s1986_s30   ;;  %s33_s22 = sadd.s32 1, %s1982_s29 }
  0x56   : > { %s30_s12 = ssub.s32 %s1986_s30, %s2179_s27  ;;  %p40_p8 = scmp.ne.s32.totalorder %s1982_s29, %s1978_s28 }
  0x57   : > { %p31_p4 = scmp.eq.s32.totalorder %s30_s12, 0  ;;  %p41_p13 = scmp.eq.s32.totalorder %s1986_s30, 0 }
  0x58   : > { %p1684_p6 = scmp.lt.s32.totalorder %s1986_s30, 2  ;;  %p2456_p3 = scmp.eq.s32.totalorder %s2069_s9, 1 }
  0x59   : > { %s2189_s23 = scalar_select %p31_p4, %s1982_s29, %s33_s22  }
  0x5a   : > { %p42_p10 = por %p41_p13, %p40_p8  ;;  %p2193_p5 = por %p2456_p3, %p40_p8 }
  0x5b   : > { %s294_s16 = sand.u32 1, %s1982_s29   ;;  %s1510_s25 = sshll.u32 %s1986_s30, 10 }
  0x5c   : > { %s1418_s20 = sshll.u32 %s294_s16, 6  ;;  %s2202_s17 = scalar_lea.hbm %s2435_s0, %s1510_s25 }
  0x5d   : > { %s298_s15 = scalar_lea.vmem [#allocation2], %s1418_s20  ;;  %p2204_p11 = pnand %p1684_p6, %p42_p10 }
  0x5e   : > { %s306_s18 = sshll.u32 %s298_s15, 4  ;;  %s2210_s19 = scalar_lea.sflag [#allocation3], %s294_s16  ;;  %s2208_s18 = int_to_ptr.vmem [resolvable:$true] %s306_s18 }
  0x5f   : > { %s1882_s21 = scalar_lea.hbm %s2202_s17, 1024  ;;  %p1884_p9 = pneg %p2204_p11 }
  0x60   : > { %p1883_p7 = scmp.ne.s32.totalorder %s2202_s17, %s1882_s21  ;;  %s1887_s25 = scalar_lea.hbm %s2435_s0, 2048 }
  0x61   : > { %p1888_p2 = scmp.lt.u32.totalorder %s2202_s17, %s2435_s0  ;;  %p1889_p1 = scmp.lt.u32.totalorder %s1887_s25, %s1882_s21 }
  0x62   : > { %p1885_p12 = pnand %p1884_p9, %p1883_p7  ;;  %p1891_p8 = scmp.lt.u32.totalorder %s1882_s21, %s2202_s17 }
  0x63   : > { %p1890_p4 = por %p1889_p1, %p1888_p2 }
  0x64   : > { %p1886_p0 = pneg %p1885_p12 }
  0x65   : > { %p1892_p13 = por %p1891_p8, %p1890_p4 }
  0x67   : > { %p1893_p6 = pnand %p1892_p13, %p1886_p0 }
  0x69   : > { %1896 = shalt.err (!%p1893_p6)
}
  0x6a   : > { %s1897_s16 = scalar_lea.vmem %s2208_s18, 1024  ;;  %s1995_s14 = smov [#allocation2]  }
  0x6b   : > { %p1898_p10 = scmp.ne.s32.totalorder %s2208_s18, %s1897_s16  ;;  %s1902_s15 = sshll.u32 %s1995_s14, 4  ;;  %s1903_s15 = int_to_ptr.vmem [resolvable:$false] %s1902_s15 }
  0x6c   : > { %s1904_s12 = scalar_lea.vmem %s1903_s15, 2048  ;;  %p1905_p12 = scmp.lt.s32.totalorder %s2208_s18, %s1903_s15 }
  0x6d   : > { %p1900_p3 = pnand %p1898_p10, %p1884_p9  ;;  %p1906_p2 = scmp.lt.s32.totalorder %s1904_s12, %s1897_s16 }
  0x6f   : > { %p1901_p7 = pneg %p1900_p3  ;;  %p1907_p1 = por %p1906_p2, %p1905_p12 }
  0x71   : > { %p1908_p4 = pnand %p1907_p1, %p1901_p7 }
  0x73   : > { %1911 = shalt.err (!%p1908_p4)
}
  0x74   : > { %s1996_s21 = smov 256   ;;  %s1997_s22 = smov 16  }
  0x75   : > { %1676 = dma.hbm_to_vmem [thread:$0]  (!%p2204_p11), %s2202_s17, 1024, %s2208_s18, %s2210_s19, %s1996_s21, %s1996_s21, %s1997_s22  }
  0x76   : > { %p2459_p9 = scmp.ne.s32.totalorder %s2453_s13, 0 }
  0x77   : > { %s2241_s25 = sand.u32 (!%p2459_p9), 1, %s1978_s28   ;;  %p2460_p0 = scmp.ne.s32.totalorder (!%p2459_p9), %s2450_s11, 0 }
  0x78   : > { %318 = sbr.rel (%p2459_p9) target bundleno = 930 (0x3a2), region = 52  ;;  %s1423_s20 = sshll.u32 (!%p2459_p9), %s2241_s25, 6 }
  0x79   : > { %s321_s10 = scalar_lea.sflag (!%p2459_p9), [#allocation3], %s2241_s25  ;;  %s2247_s16 = scalar_lea.vmem (!%p2459_p9), [#allocation2], %s1423_s20 }
  0x7f   : > { %1957 = dma.done.wait (%p2460_p0), %s321_s10, 1024  }
  0x80   : > { %1959 = vsyncadd (%p2460_p0), %s321_s10, 4294966272  ;;  %p2461_p11 = scmp.eq.s32.totalorder %s2069_s9, 0 }
  0x82   : > { %1961 = dma.done.wait (%p2461_p11), [#allocation6], 5120   ;;  %p2462_p8 = pmov %p2461_p11 }
  0x84   : > { %1963 = vsyncadd (%p2462_p8), [#allocation6], 4294962176  ;;  %p2463_p13 = pmov %p2462_p8 }
  0x85   : > { %p2464_p6 = pmov %p2462_p8 }
  0x86   : > { %1965 = dma.done.wait (%p2463_p13), [#allocation9], 2048  }
  0x87   : > { %1967 = vsyncadd (%p2464_p6), [#allocation9], 4294965248  ;;  %v1734_v0 = vld [vmem:[#allocation5 + $0x40] sm:$0xff]   ;;  %v1736_v2 = vld [vmem:[#allocation5 + $0x48] sm:$0xff]   ;;  %v696_v48 = vlaneseq  ;;  %vm1998_vm3 = vmmov 1   ;;  %s1512_s13 = sshll.u32 %s2069_s9, 10 }
  0x88   : > { %v1735_v1 = vld [vmem:[#allocation5] sm:$0xff]   ;;  %1513 = vmatprep.subr.bf16.mxu0 %v1734_v0  ;;  %v1737_v3 = vld [vmem:[#allocation5 + $0x8] sm:$0xff]   ;;  %v1738_v4 = vld [vmem:[#allocation5 + $0x50] sm:$0xff]   ;;  %s2391_s18 = scalar_lea.hbm %s2443_s8, %s1512_s13  ;;  %s1296_s9 = scalar_lea.sflag [#allocation4], %s2241_s25 }
  0x89   : > { %1514 = vmatpush3.bf16.msra.mxu0 %v1735_v1  ;;  %v1739_v5 = vld [vmem:[#allocation5 + $0x10] sm:$0xff]   ;;  %v1740_v6 = vld [vmem:[#allocation5 + $0x58] sm:$0xff]   ;;  %v1742_v8 = vld [vmem:[#allocation5 + $0x60] sm:$0xff]   ;;  %v2299_v56 = vshrl.u32 %v696_v48, 7  ;;  %s2000_s19 = smov [#allocation10]  }
  0x8a   : > { %1515 = vmatprep.subr.bf16.mxu0 %v1736_v2  ;;  %v1741_v7 = vld [vmem:[#allocation5 + $0x18] sm:$0xff]   ;;  %v1743_v9 = vld [vmem:[#allocation5 + $0x20] sm:$0xff]   ;;  %v1744_v10 = vld [vmem:[#allocation5 + $0x68] sm:$0xff]   ;;  %s1916_s14 = sshll.u32 %s2000_s19, 4  ;;  %s1917_s14 = int_to_ptr.vmem [resolvable:$false] %s1916_s14 }
  0x8b   : > { %v2262_v11 = vld [vmem:[%s2247_s16 + $0x8] sm:$0xff]  ;;  %v2265_v12 = vld [vmem:[%s2247_s16 + $0x18] sm:$0xff]  ;;  %v1746_v15 = vld [vmem:[#allocation5 + $0x70] sm:$0xff]   ;;  %vm769_vm0 = vcmp.lt.s32.totalorder %v2299_v56, 1  ;;  %vm940_vm1 = vcmp.lt.s32.totalorder %v2299_v56, 7  ;;  %v705_v0 = vand.u32 15, %v2299_v56 }
  0x8c   : > { %v381_v13 = vpack.c.bf16 %v2265_v12, %v2262_v11  ;;  %v1745_v14 = vld [vmem:[#allocation5 + $0x28] sm:$0xff]   ;;  %v1750_v16 = vld [vmem:[#allocation7 + $0x40] sm:$0xff]   ;;  %v1747_v18 = vld [vmem:[#allocation5 + $0x30] sm:$0xff]   ;;  %s1918_s15 = scalar_lea.vmem %s1917_s14, 2048 }
  0x8d   : > { %1516 = vmatpush3.bf16.msra.mxu0 %v1737_v3  ;;  %v1751_v17 = vld [vmem:[#allocation7 + $0x48] sm:$0xff]   ;;  %1571 = vmatprep.subr.bf16.mxu1 %v1750_v16  ;;  %v1748_v19 = vld [vmem:[#allocation5 + $0x78] sm:$0xff]   ;;  %v1752_v20 = vld [vmem:[#allocation7 + $0x50] sm:$0xff]  }
  0x8e   : > { %1517 = vmatprep.subr.bf16.mxu0 %v1738_v4  ;;  %551 = vmatprep.mubr.bf16.mxu0 %v381_v13  ;;  %v1749_v21 = vld [vmem:[#allocation5 + $0x38] sm:$0xff]   ;;  %v2270_v22 = vld [vmem:[%s2247_s16] sm:$0xff]  ;;  %v2273_v23 = vld [vmem:[%s2247_s16 + $0x10] sm:$0xff]  ;;  %v2310_v13 = vadd.s32 4294967295, %v705_v0 }
  0x8f   : > { %1572 = vmatpush3.bf16.msra.mxu1 %v1750_v16  ;;  %v1753_v24 = vld [vmem:[#allocation7 + $0x58] sm:$0xff]   ;;  %v2276_v25 = vld [vmem:[%s2247_s16 + $0x28] sm:$0xff]  ;;  %v380_v27 = vpack.c.bf16 %v2273_v23, %v2270_v22  ;;  %v2286_v29 = vld [vmem:[%s2247_s16 + $0x20] sm:$0xff] }
  0x90   : > { %1573 = vmatprep.subr.bf16.mxu1 %v1751_v17  ;;  %v2279_v26 = vld [vmem:[%s2247_s16 + $0x38] sm:$0xff]  ;;  %v2289_v30 = vld [vmem:[%s2247_s16 + $0x30] sm:$0xff]  ;;  %v1754_v32 = vld [vmem:[#allocation7 + $0x60] sm:$0xff]   ;;  %vm753_vm2 = vcmp.ge.s32.totalorder %v2310_v13, 0  ;;  %s368_s16 = scalar_lea.vmem [#allocation10], %s1423_s20 }
  0x91   : > { %1518 = vmatpush3.bf16.msra.mxu0 %v1739_v5  ;;  %v383_v28 = vpack.c.bf16 %v2279_v26, %v2276_v25  ;;  %v382_v31 = vpack.c.bf16 %v2289_v30, %v2286_v29  ;;  %v1755_v33 = vld [vmem:[#allocation7 + $0x68] sm:$0xff]   ;;  %v1756_v34 = vld [vmem:[#allocation7 + $0x70] sm:$0xff]   ;;  %v1757_v35 = vld [vmem:[#allocation7 + $0x78] sm:$0xff]   ;;  %s1310_s11 = sshll.u32 %s368_s16, 4  ;;  %s2385_s11 = int_to_ptr.vmem [resolvable:$true] %s1310_s11 }
  0x92   : > { %1519 = vmatprep.subr.bf16.mxu0 %v1740_v6  ;;  %v2293_v36 = vld [vmem:[#allocation7] sm:$0xff]   ;;  %v1779_v39 = vld [vmem:[#allocation8 + $0x14] ss:$8 sps:$4 sm:$0xff]   ;;  %v1777_v40 = vld [vmem:[#allocation8 + $0x10] ss:$8 sps:$4 sm:$0xff]   ;;  %s1912_s26 = scalar_lea.vmem %s2385_s11, 1024  ;;  %p1919_p12 = scmp.lt.s32.totalorder %s2385_s11, %s1917_s14 }
  0x93   : > { %1574 = vmatpush3.bf16.msra.mxu1 %v1751_v17  ;;  %v1774_v37 = vld [vmem:[#allocation8] ss:$8 sps:$4 sm:$0xff]   ;;  %v1776_v38 = vld [vmem:[#allocation8 + $0x4] ss:$8 sps:$4 sm:$0xff]   ;;  %v1785_v43 = vld [vmem:[#allocation8 + $0x34] ss:$8 sps:$4 sm:$0xff]   ;;  %p1913_p10 = scmp.ne.s32.totalorder %s2385_s11, %s1912_s26  ;;  %p1920_p2 = scmp.lt.s32.totalorder %s1918_s15, %s1912_s26 }
  0x94   : > { %1575 = vmatprep.subr.bf16.mxu1 %v1752_v20  ;;  %v1782_v41 = vld [vmem:[#allocation8 + $0x24] ss:$8 sps:$4 sm:$0xff]   ;;  %v1780_v42 = vld [vmem:[#allocation8 + $0x20] ss:$8 sps:$4 sm:$0xff]   ;;  %v1783_v44 = vld [vmem:[#allocation8 + $0x30] ss:$8 sps:$4 sm:$0xff]  }
  0x95   : > { %1520 = vmatpush3.bf16.msra.mxu0 %v1741_v7  ;;  %v1788_v45 = vld [vmem:[#allocation8 + $0x44] ss:$8 sps:$4 sm:$0xff]   ;;  %v1786_v46 = vld [vmem:[#allocation8 + $0x40] ss:$8 sps:$4 sm:$0xff]   ;;  %vm1463_vm4 = vmpackc.low %vm1998_vm3, %vm753_vm2  ;;  %p1914_p3 = pnand %p1913_p10, %p2193_p5  ;;  %p1921_p1 = por %p1920_p2, %p1919_p12 }
  0x96   : > { %1521 = vmatprep.subr.bf16.mxu0 %v1742_v8  ;;  %v1428_v49 = vld [vmem:[%s2437_s2] ss:$0 sm:$0xff]  ;;  %v1765_v48 = vld [vmem:[#allocation7 + $0x38] sm:$0xff]  }
  0x97   : > { %1576 = vmatpush3.bf16.msra.mxu1 %v1752_v20  ;;  %v1789_v0 = vld [vmem:[#allocation8 + $0x50] ss:$8 sps:$4 sm:$0xff]   ;;  %p1915_p7 = pneg %p1914_p3 }
  0x98   : > { %1577 = vmatprep.subr.bf16.mxu1 %v1753_v24 }
  0x99   : > { %1522 = vmatpush3.bf16.msra.mxu0 %v1743_v9  ;;  %p1922_p4 = pnand %p1921_p1, %p1915_p7 }
  0x9a   : > { %1523 = vmatprep.subr.bf16.mxu0 %v1744_v10 }
  0x9b   : > { %1578 = vmatpush3.bf16.msra.mxu1 %v1753_v24 }
  0x9c   : > { %1579 = vmatprep.subr.bf16.mxu1 %v1754_v32 }
  0x9d   : > { %1524 = vmatpush3.bf16.msra.mxu0 %v1745_v14 }
  0x9e   : > { %1525 = vmatprep.subr.bf16.mxu0 %v1746_v15 }
  0x9f   : > { %1580 = vmatpush3.bf16.msra.mxu1 %v1754_v32 }
  0xa0   : > { %1581 = vmatprep.subr.bf16.mxu1 %v1755_v33 }
  0xa1   : > { %1526 = vmatpush3.bf16.msra.mxu0 %v1747_v18 }
  0xa2   : > { %1527 = vmatprep.subr.bf16.mxu0 %v1748_v19 }
  0xa3   : > { %1582 = vmatpush3.bf16.msra.mxu1 %v1755_v33 }
  0xa4   : > { %1583 = vmatprep.subr.bf16.mxu1 %v1756_v34 }
  0xa5   : > { %1528 = vmatpush3.bf16.msra.mxu0 %v1749_v21 }
  0xa6   : > { %1206 = vmatprep.subr.bf16.mxu0 %v1776_v38 }
  0xa7   : > { %1584 = vmatpush3.bf16.msra.mxu1 %v1756_v34 }
  0xa8   : > { %552 = vmatmul.mubr.bf16.vlgmr.msra.gmra.mrb[0].mxu0 %v380_v27  ;;  %1585 = vmatprep.subr.bf16.mxu1 %v1757_v35  ;;  %v1759_v27 = vld [vmem:[#allocation7 + $0x8] sm:$0xff]  }
  0xa9   : > { %559 = vmatprep.mubr.bf16.mxu0 %v383_v28  ;;  %1207 = vmatpush1.bf16.msra.mxu0 %v1774_v37 }
  0xaa   : > { %1208 = vmatprep.subr.bf16.mxu0 %v1779_v39 }
  0xab   : > { %1586 = vmatpush3.bf16.msra.mxu1 %v1757_v35 }
  0xac   : > { %1591 = vmatprep.subr.bf16.mxu1 %v2293_v36 }
  0xad   : > { %1209 = vmatpush1.bf16.msra.mxu0 %v1777_v40  ;;  %v1760_v40 = vld [vmem:[#allocation7 + $0x10] sm:$0xff]  }
  0xae   : > { %1210 = vmatprep.subr.bf16.mxu0 %v1782_v41  ;;  %v1761_v41 = vld [vmem:[#allocation7 + $0x18] sm:$0xff]  }
  0xb0   : > { %560 = vmatmul.mubr.bf16.gmra.mrb[4].mxu0 %v382_v31 }
  0xb1   : > { %1211 = vmatpush1.bf16.msra.mxu0 %v1780_v42  ;;  %v1762_v42 = vld [vmem:[#allocation7 + $0x20] sm:$0xff]  }
  0xb2   : > { %1212 = vmatprep.subr.bf16.mxu0 %v1785_v43  ;;  %v1763_v43 = vld [vmem:[#allocation7 + $0x28] sm:$0xff]  }
  0xb5   : > { %1213 = vmatpush1.bf16.msra.mxu0 %v1783_v44  ;;  %v698_v44 = vadd.s32 8, %v2299_v56 }
  0xb6   : > { %1214 = vmatprep.subr.bf16.mxu0 %v1788_v45  ;;  %v1764_v45 = vld [vmem:[#allocation7 + $0x30] sm:$0xff]  }
  0xb9   : > { %1215 = vmatpush1.bf16.msra.mxu0 %v1786_v46 }
 0x17b   : > { %v1529_v47 = vpop.f32.mrb[0].mxu0 }
 0x17c   : > { %v1530_v50 = vpop.f32.mrb[1].mxu0 }
 0x17d   : > { %v1531_v51 = vadd.f32 %v1530_v50, %v1529_v47  ;;  %v1532_v52 = vpop.f32.mrb[2].mxu0  ;;  %v712_v47 = vand.u32 15, %v698_v44 }
 0x17e   : > { %v1533_v53 = vpop.f32.mrb[3].mxu0 }
 0x17f   : > { %v554_v54 = vadd.f32 %v1531_v51, %v1428_v49  ;;  %v1534_v55 = vadd.f32 %v1533_v53, %v1532_v52  ;;  %v2338_v50 = vadd.s32 1, %v712_v47  ;;  %v1766_v51 = vld [vmem:[#allocation7 + $0x80] sm:$0xff]   ;;  %v1767_v52 = vld [vmem:[#allocation7 + $0x88] sm:$0xff]   ;;  %v1768_v53 = vld [vmem:[#allocation7 + $0x90] sm:$0xff]   ;;  %v1271_v47 = vsub.s32 0, %v2299_v56 }
 0x181   : > { %v568_v57 = vmax.f32 %v554_v54, 0.0  ;;  %v557_v58 = vadd.f32 %v1534_v55, %v1428_v49  ;;  %vm929_vm6 = vcmp.lt.s32.totalorder %v2338_v50, 16  ;;  %v1769_v54 = vld [vmem:[#allocation7 + $0x98] sm:$0xff]   ;;  %v1770_v55 = vld [vmem:[#allocation7 + $0xa0] sm:$0xff]  }
 0x182   : > { %vm1478_vm8 = vmpackc.low %vm929_vm6, %vm1998_vm3 }
 0x183   : > { %v569_v59 = vmax.f32 %v557_v58, 0.0  ;;  %v1535_v60 = vpop.f32.mrb[4].mxu0  ;;  %v765_v61 = vrot.slane %v568_v57, 7  ;;  %v936_v62 = vrot.slane %v568_v57, 1  ;;  %v700_v58 = vadd.s32 24, %v2299_v56 }
 0x184   : > { %v1536_v63 = vpop.f32.mrb[5].mxu0 }
 0x185   : > { %v766_v1 = vrot.slane %v569_v59, 7  ;;  %v937_v2 = vrot.slane %v569_v59, 1  ;;  %v1537_v3 = vadd.f32 %v1536_v63, %v1535_v60  ;;  %v1538_v4 = vpop.f32.mrb[6].mxu0  ;;  %v572_v5 = vpack.c.bf16 %v569_v59, %v568_v57  ;;  %v1771_v57 = vld [vmem:[#allocation7 + $0xa8] sm:$0xff]   ;;  %v1772_v59 = vld [vmem:[#allocation7 + $0xb0] sm:$0xff]  }
 0x186   : > { %v1539_v6 = vpop.f32.mrb[7].mxu0  ;;  %v726_v60 = vand.u32 15, %v700_v58  ;;  %v1791_v63 = vld [vmem:[#allocation8 + $0x54] ss:$8 sps:$4 sm:$0xff]  }
 0x187   : > { %v562_v7 = vadd.f32 %v1537_v3, %v1428_v49  ;;  %v1540_v8 = vadd.f32 %v1539_v6, %v1538_v4  ;;  %1587 = vmatprep.mubr.bf16.mxu1 %v572_v5  ;;  %v772_v9 = vsel %vm769_vm0, %v765_v61, %v766_v1  ;;  %v2308_v10 = vsel %vm940_vm1, %v936_v62, %v937_v2  ;;  %v1797_v3 = vld [vmem:[#allocation8 + $0x74] ss:$8 sps:$4 sm:$0xff]   ;;  %v1795_v4 = vld [vmem:[#allocation8 + $0x70] ss:$8 sps:$4 sm:$0xff]   ;;  %v1469_v6 = vld [vmem:[%s2439_s4] ss:$0 sm:$0xff] }
 0x188   : > { %1216 = vmatprep.subr.bf16.mxu0 %v1791_v63  ;;  %v1999_v5 = vmov 0  }
 0x189   : > { %v570_v14 = vmax.f32 %v562_v7, 0.0  ;;  %v565_v15 = vadd.f32 %v1540_v8, %v1428_v49  ;;  %1217 = vmatpush1.bf16.msra.mxu0 %v1789_v0  ;;  %1238 = vmatprep.mubr.bf16.mxu0 %v1999_v5  ;;  %v1446_v7 = vld [vmem:[%s2439_s4 + $0x1] ss:$0 sm:$0xff] }
 0x18b   : > { %v767_v16 = vrot.slane %v570_v14, 7  ;;  %v938_v17 = vrot.slane %v570_v14, 1  ;;  %v571_v18 = vmax.f32 %v565_v15, 0.0  ;;  %v1485_v15 = vld [vmem:[%s2439_s4 + $0x2] ss:$0 sm:$0xff] }
 0x18d   : > { %v771_v19 = vsel %vm769_vm0, %v766_v1, %v767_v16  ;;  %v768_v20 = vrot.slane %v571_v18, 7  ;;  %v939_v21 = vrot.slane %v571_v18, 1  ;;  %v573_v24 = vpack.c.bf16 %v571_v18, %v570_v14  ;;  %v1794_v1 = vld [vmem:[#allocation8 + $0x64] ss:$8 sps:$4 sm:$0xff]  }
 0x18e   : > { %v942_v28 = vsel %vm940_vm1, %v937_v2, %v938_v17  ;;  %v1792_v2 = vld [vmem:[#allocation8 + $0x60] ss:$8 sps:$4 sm:$0xff]   ;;  %1218 = vmatprep.subr.bf16.mxu0 %v1794_v1 }
 0x18f   : > { %v770_v31 = vsel %vm769_vm0, %v767_v16, %v768_v20  ;;  %v2321_v32 = vsel %vm940_vm1, %v938_v17, %v939_v21  ;;  %v2325_v33 = vsel %vm940_vm1, %v939_v21, %v936_v62  ;;  %1588 = vmatmul.mubr.bf16.vlgmr.msra.gmra.mrb[0].mxu1 %v573_v24  ;;  %v773_v34 = vsel %vm769_vm0, %v768_v20, %v765_v61  ;;  %v1773_v61 = vld [vmem:[#allocation7 + $0xb8] sm:$0xff]   ;;  %v1486_v20 = vld [vmem:[%s2440_s5] ss:$0 sm:$0xff] }
 0x190   : > { %1592 = vmatpush3.bf16.msra.mxu1 %v2293_v36  ;;  %v1464_v35 = vpack.c.bf16 %v772_v9, %v773_v34  ;;  %v1467_v37 = vpack.c.bf16 %v770_v31, %v771_v19  ;;  %v1479_v38 = vpack.c.bf16 %v942_v28, %v2308_v10  ;;  %v1482_v39 = vpack.c.bf16 %v2325_v33, %v2321_v32 }
 0x191   : > { %1593 = vmatprep.subr.bf16.mxu1 %v1759_v27  ;;  %v699_v36 = vadd.s32 16, %v2299_v56  ;;  %v923_v62 = vadd.s32 1, %v726_v60  ;;  %1219 = vmatpush1.bf16.msra.mxu0 %v1792_v2  ;;  %v912_v9 = vsel %vm753_vm2, %v1469_v6, 0.0  ;;  %v1637_v16 = vadd.f32 %v1469_v6, %v1446_v7 }
 0x192   : > { %1607 = vmatprep.mubr.msk.bf16.mxu1 %vm1463_vm4, %v1464_v35  ;;  %1220 = vmatprep.subr.bf16.mxu0 %v1797_v3  ;;  %v1633_v14 = vadd.f32 %v1446_v7, %v912_v9  ;;  %v1086_v32 = vsel %vm929_vm6, %v1485_v15, 0.0 }
 0x193   : > { %v719_v46 = vand.u32 15, %v699_v36  ;;  %vm931_vm9 = vcmp.lt.s32.totalorder %v923_v62, 16 }
 0x194   : > { %1594 = vmatpush3.bf16.msra.mxu1 %v1759_v27  ;;  %vm1481_vm10 = vmpackc.low %vm931_vm9, %vm1998_vm3  ;;  %v1088_v27 = vsel %vm931_vm9, %v1485_v15, 0.0 }
 0x195   : > { %1595 = vmatprep.subr.bf16.mxu1 %v1760_v40  ;;  %v751_v49 = vadd.s32 4294967295, %v719_v46  ;;  %1221 = vmatpush1.bf16.msra.mxu0 %v1795_v4 }
 0x197   : > { %vm755_vm5 = vcmp.ge.s32.totalorder %v751_v49, 0  ;;  %v1275_v49 = vsub.s32 1, %v2299_v56 }
 0x198   : > { %1596 = vmatpush3.bf16.msra.mxu1 %v1760_v40  ;;  %vm1466_vm7 = vmpackc.low %vm1998_vm3, %vm755_vm5  ;;  %v914_v8 = vsel %vm755_vm5, %v1469_v6, 0.0 }
 0x199   : > { %1597 = vmatprep.subr.bf16.mxu1 %v1761_v41  ;;  %v1631_v10 = vadd.f32 %v1446_v7, %v914_v8 }
 0x19c   : > { %1598 = vmatpush3.bf16.msra.mxu1 %v1761_v41 }
 0x19d   : > { %1599 = vmatprep.subr.bf16.mxu1 %v1762_v42 }
 0x1a0   : > { %1600 = vmatpush3.bf16.msra.mxu1 %v1762_v42 }
 0x1a1   : > { %1601 = vmatprep.subr.bf16.mxu1 %v1763_v43 }
 0x1a4   : > { %1602 = vmatpush3.bf16.msra.mxu1 %v1763_v43 }
 0x1a5   : > { %1603 = vmatprep.subr.bf16.mxu1 %v1764_v45 }
 0x1a8   : > { %1604 = vmatpush3.bf16.msra.mxu1 %v1764_v45 }
 0x1a9   : > { %1605 = vmatprep.subr.bf16.mxu1 %v1765_v48 }
 0x1ac   : > { %1606 = vmatpush3.bf16.msra.mxu1 %v1765_v48  ;;  %v1267_v48 = vld [vmem:[%s2442_s7] sm:$0x3] }
 0x1ad   : > { %1611 = vmatprep.subr.bf16.mxu1 %v1766_v51  ;;  %v1272_v50 = vrot.slane %v1267_v48, %v1271_v47 }
 0x1af   : > { %1608 = vmatmul.mubr.msk.bf16.vlgmr.msra.gmra.mrb[0].mxu1 %vm1466_vm7, %v1467_v37 }
 0x1b0   : > { %1612 = vmatpush3.bf16.msra.mxu1 %v1766_v51  ;;  %1627 = vmatprep.mubr.msk.bf16.mxu1 %vm1478_vm8, %v1479_v38 }
 0x1b1   : > { %1613 = vmatprep.subr.bf16.mxu1 %v1767_v52 }
 0x1b4   : > { %1614 = vmatpush3.bf16.msra.mxu1 %v1767_v52  ;;  %v1276_v52 = vrot.slane %v1267_v48, %v1275_v49 }
 0x1b5   : > { %1615 = vmatprep.subr.bf16.mxu1 %v1768_v53 }
 0x1b8   : > { %1616 = vmatpush3.bf16.msra.mxu1 %v1768_v53 }
 0x1b9   : > { %1617 = vmatprep.subr.bf16.mxu1 %v1769_v54 }
 0x1bc   : > { %1618 = vmatpush3.bf16.msra.mxu1 %v1769_v54 }
 0x1bd   : > { %1619 = vmatprep.subr.bf16.mxu1 %v1770_v55 }
 0x1c0   : > { %1620 = vmatpush3.bf16.msra.mxu1 %v1770_v55 }
 0x1c1   : > { %1621 = vmatprep.subr.bf16.mxu1 %v1771_v57 }
 0x1c4   : > { %1622 = vmatpush3.bf16.msra.mxu1 %v1771_v57 }
 0x1c5   : > { %1623 = vmatprep.subr.bf16.mxu1 %v1772_v59 }
 0x1c8   : > { %1624 = vmatpush3.bf16.msra.mxu1 %v1772_v59 }
 0x1c9   : > { %1625 = vmatprep.subr.bf16.mxu1 %v1773_v61 }
 0x1cc   : > { %1626 = vmatpush3.bf16.msra.mxu1 %v1773_v61 }
 0x1cf   : > { %1628 = vmatmul.mubr.msk.bf16.vlgmr.msra.gmra.mrb[0].mxu1 %vm1481_vm10, %v1482_v39 }
 0x2a2   : > { %v1629_v17 = vpop.f32.mrb[0].mxu1 }
 0x2a3   : > { %v1632_v18 = vadd.f32 %v1631_v10, %v1629_v17  ;;  %v1058_v19 = vpop.f32.mrb[1].mxu1 }
 0x2a4   : > { %v1634_v21 = vadd.f32 %v1633_v14, %v1058_v19  ;;  %v1630_v24 = vpop.f32.mrb[2].mxu1 }
 0x2a5   : > { %v1091_v13 = vadd.f32 %v1632_v18, %v1485_v15  ;;  %v1636_v28 = vadd.f32 %v1637_v16, %v1630_v24  ;;  %v1061_v31 = vpop.f32.mrb[3].mxu1 }
 0x2a6   : > { %v1089_v33 = vadd.f32 %v1634_v21, %v1485_v15  ;;  %v1638_v34 = vadd.f32 %v1637_v16, %v1061_v31 }
 0x2a7   : > { %v1102_v35 = vadd.f32 %v1486_v20, %v1091_v13  ;;  %v1092_v37 = vadd.f32 %v1636_v28, %v1088_v27 }
 0x2a8   : > { %v1100_v38 = vadd.f32 %v1486_v20, %v1089_v33  ;;  %v1090_v39 = vadd.f32 %v1638_v34, %v1086_v32 }
 0x2a9   : > { %v1103_v40 = vadd.f32 %v1486_v20, %v1092_v37  ;;  %v1106_v42 = vmax.f32 %v1102_v35, 0.0 }
 0x2aa   : > { %v1101_v41 = vadd.f32 %v1486_v20, %v1090_v39  ;;  %v1104_v36 = vmax.f32 %v1100_v38, 0.0 }
 0x2ab   : > { %v1107_v43 = vmax.f32 %v1103_v40, 0.0 }
 0x2ac   : > { %v1105_v44 = vmax.f32 %v1101_v41, 0.0 }
 0x2ad   : > { %v1109_v45 = vpack.c.bf16 %v1107_v43, %v1106_v42 }
 0x2ae   : > { %v1108_v46 = vpack.c.bf16 %v1105_v44, %v1104_v36 }
 0x2b0   : > { %1239 = vmatmul.mubr.bf16.vlgmr.msra.gmra.mrb[8].mxu0 %v1108_v46 }
 0x2b1   : > { %1248 = vmatprep.mubr.bf16.mxu0 %v1999_v5 }
 0x2b8   : > { %1249 = vmatmul.mubr.bf16.gmra.mrb[12].mxu0 %v1109_v45 }
 0x383   : > { %v1240_v51 = vpop.f32.mrb[8].mxu0 }
 0x384   : > { %v1259_v53 = vadd.f32 %v1240_v51, %v2270_v22  ;;  %v1242_v54 = vpop.f32.mrb[9].mxu0 }
 0x385   : > { %v1260_v55 = vadd.f32 %v1242_v54, %v2262_v11  ;;  %v1244_v57 = vpop.f32.mrb[10].mxu0 }
 0x386   : > { %v1279_v58 = vadd.f32 %v1272_v50, %v1259_v53  ;;  %v1261_v59 = vadd.f32 %v1244_v57, %v2273_v23  ;;  %v1246_v60 = vpop.f32.mrb[11].mxu0 }
 0x387   : > { %v1280_v61 = vadd.f32 %v1276_v52, %v1260_v55  ;;  %v1262_v62 = vadd.f32 %v1246_v60, %v2265_v12 }
 0x388   : > { %1287 = vst [vmem:[%s368_s16] sm:$0xff] %v1279_v58  ;;  %v1281_v56 = vadd.f32 %v1272_v50, %v1261_v59 }
 0x389   : > { %1288 = vst [vmem:[%s368_s16 + $0x8] sm:$0xff] %v1280_v61  ;;  %v1282_v63 = vadd.f32 %v1276_v52, %v1262_v62 }
 0x38a   : > { %1289 = vst [vmem:[%s368_s16 + $0x10] sm:$0xff] %v1281_v56 }
 0x38b   : > { %1290 = vst [vmem:[%s368_s16 + $0x18] sm:$0xff] %v1282_v63  ;;  %v1250_v22 = vpop.f32.mrb[12].mxu0 }
 0x38c   : > { %v1263_v11 = vadd.f32 %v1250_v22, %v2286_v29  ;;  %v1252_v0 = vpop.f32.mrb[13].mxu0 }
 0x38d   : > { %v1264_v23 = vadd.f32 %v1252_v0, %v2276_v25  ;;  %v1254_v1 = vpop.f32.mrb[14].mxu0 }
 0x38e   : > { %v1283_v2 = vadd.f32 %v1272_v50, %v1263_v11  ;;  %v1265_v12 = vadd.f32 %v1254_v1, %v2289_v30  ;;  %v1256_v3 = vpop.f32.mrb[15].mxu0 }
 0x38f   : > { %v1284_v4 = vadd.f32 %v1276_v52, %v1264_v23  ;;  %v1266_v5 = vadd.f32 %v1256_v3, %v2279_v26 }
 0x390   : > { %1291 = vst [vmem:[%s368_s16 + $0x20] sm:$0xff] %v1283_v2  ;;  %v1285_v29 = vadd.f32 %v1272_v50, %v1265_v12 }
 0x391   : > { %1292 = vst [vmem:[%s368_s16 + $0x28] sm:$0xff] %v1284_v4  ;;  %v1286_v25 = vadd.f32 %v1276_v52, %v1266_v5 }
 0x392   : > { %1293 = vst [vmem:[%s368_s16 + $0x30] sm:$0xff] %v1285_v29 }
 0x393   : > { %1294 = vst [vmem:[%s368_s16 + $0x38] sm:$0xff] %v1286_v25 }
 0x394   : > { %1925 = shalt.err (!%p1922_p4)
}
 0x395   : > { %s1926_s12 = scalar_lea.hbm %s2391_s18, 1024  ;;  %s1930_s10 = scalar_lea.hbm %s2443_s8, 2048 }
 0x396   : > { %p1927_p9 = scmp.ne.s32.totalorder %s2391_s18, %s1926_s12  ;;  %p1931_p8 = scmp.lt.u32.totalorder %s2391_s18, %s2443_s8 }
 0x397   : > { %p1932_p13 = scmp.lt.u32.totalorder %s1930_s10, %s1926_s12  ;;  %p1934_p10 = scmp.lt.u32.totalorder %s1926_s12, %s2391_s18 }
 0x398   : > { %p1928_p0 = pnand %p1927_p9, %p2193_p5 }
 0x399   : > { %p1933_p6 = por %p1932_p13, %p1931_p8 }
 0x39a   : > { %p1929_p11 = pneg %p1928_p0 }
 0x39b   : > { %p1935_p3 = por %p1934_p10, %p1933_p6 }
 0x39d   : > { %p1936_p7 = pnand %p1935_p3, %p1929_p11 }
 0x39f   : > { %1939 = shalt.err (!%p1936_p7)
}
 0x3a0   : > { %s2001_s20 = smov 256   ;;  %s2002_s17 = smov 16  }
 0x3a1   : > { %1661 = dma.vmem_to_hbm [thread:$0]  (%p2193_p5), %s2385_s11, 1024, %s2391_s18, %s1296_s9, %s2001_s20, %s2001_s20, %s2002_s17  }
 0x3a2 PF: > { %s2465_s26 = sld [smem:[#allocation15_spill]]  ;;  %s2466_s19 = sld [smem:[#allocation16_spill]] }
 0x3a3   : > { %p2468_p2 = scmp.ge.s32.totalorder %s1986_s30, 2 }
 0x3a8   : > { %s1325_s14 = sand.u32 1, %s2465_s26   ;;  %p2467_p12 = scmp.ne.s32.totalorder %s2466_s19, 0 }
 0x3a9   : > { %s1326_s15 = scalar_lea.sflag [#allocation4], %s1325_s14 }
 0x3aa   : > { %p1678_p1 = pnand %p2468_p2, %p2467_p12 }
 0x3ac   : > { %1969 = dma.done.wait (!%p1678_p1), %s1326_s15, 1024  }
 0x3ad   : > { %1971 = vsyncadd (!%p1678_p1), %s1326_s15, 4294966272  ;;  %s2469_s12 = smov %s2179_s27  ;;  %p23_p4 = scmp.ge.s32.totalorder %s2179_s27, 4  }
 0x3ae   : > { %s2470_s27 = smov %s1978_s28  ;;  %s2471_s28 = smov %s1982_s29 }
 0x3af   : > { %s2472_s29 = smov %s2189_s23  ;;  %s2473_s30 = smov %s2469_s12 }
 0x3b0   :  { %25 = sbr.rel (!%p23_p4) target bundleno = 7 (0x7), region = 113 }
 0x3b7   :  { %1331 = vsyncpa [#allocation3], 1 }
 0x3b8   :  { %1333 = vsyncpa [#allocation3 + $0x1], 1 }
 0x3b9   :  { %1334 = vsyncpa [#allocation6], 1 }
 0x3ba   :  { %1335 = vsyncpa [#allocation9], 1 }
 0x3bb   :  { %1336 = vsyncpa [#allocation4], 1 }
 0x3bc   :  { %1338 = vsyncpa [#allocation4 + $0x1], 1 }

</bundles_post_ra>
